<compile_context>
chip_gen: v5e
topology: v5e:2x2
jax: 0.10.0
libtpu: 0.0.40
codegen_flags: <defaults>
</compile_context>

<pallas_src>
import functools

import jax
import jax.numpy as jnp
from jax import lax
from jax.experimental import pallas as pl
from jax.experimental.pallas import tpu as pltpu


def _cutout_kernel(params_ref, x_ref, o_ref, *, replace):
    """Masked fill of one (C, TILE_H, W) uint8 tile.

    params_ref (SMEM int32): [low_h, high_h, low_w, high_w, start_block]
    """
    low_h = params_ref[0]
    high_h = params_ref[1]
    low_w = params_ref[2]
    high_w = params_ref[3]
    start_block = params_ref[4]

    c, th, w = x_ref.shape

    # Global row index of the first row of this (box-restricted) H-tile.
    row0 = (start_block + pl.program_id(0)) * th

    # Factored in-box mask: O(TILE_H + W) compares, one broadcasted AND to
    # (TILE_H, W); pure booleans, no int casts / multiplies.
    row = row0 + lax.broadcasted_iota(jnp.int32, (th, 1), 0)   # (th, 1)
    col = lax.broadcasted_iota(jnp.int32, (1, w), 1)           # (1, w)
    in_box = (row >= low_h) & (row < high_h) & (col >= low_w) & (col < high_w)

    rep = jnp.asarray(replace, dtype=o_ref.dtype)
    # Stay in uint8; reuse the same (th, w) mask vregs for every channel.
    for ch in range(c):
        o_ref[ch] = jnp.where(in_box, rep, x_ref[ch])


def _vmem_params():
    """(per-tile budget, vmem_limit_bytes), generation-aware."""
    cap = 64 * 1024 * 1024
    try:
        info = pltpu.get_tpu_info()
        cap = getattr(info, "vmem_capacity_bytes", cap) or cap
    except Exception:
        pass
    if cap > 96 * 1024 * 1024:                       # v5e / v6e: 128 MiB VMEM
        return 8 * 1024 * 1024, 64 * 1024 * 1024
    return 4 * 1024 * 1024, 32 * 1024 * 1024         # v7x: 64 MiB per TC


def _pick_tile_h(c, h, w, itemsize, budget_bytes):
    """Largest H-tile (multiple of 32 rows, or full H) within the per-tile
    budget. With input + output double-buffered (x4 buffers) this stays well
    inside the scoped VMEM limit on every generation."""
    if h < 32 or c * h * w * itemsize <= budget_bytes:
        return h
    max_rows = budget_bytes // max(1, c * w * itemsize)
    return max(32, (min(h, max_rows) // 32) * 32)


def _cutout_apply(image, low_h, high_h, low_w, high_w, *, max_box_h,
                  replace, tile_h=None):
    """Run the Pallas masked-fill over only the H-tiles intersecting the box.

    Box bounds are traced int32 scalars; `max_box_h` is the static maximum box
    height (2*pad_size), used to size the restricted grid.
    """
    c, h, w = image.shape
    itemsize = jnp.dtype(image.dtype).itemsize
    budget_bytes, vmem_limit = _vmem_params()
    if tile_h is None:
        tile_h = _pick_tile_h(c, h, w, itemsize, budget_bytes)
    num_tiles = pl.cdiv(h, tile_h)

    # A box of height <= max_box_h intersects at most cdiv(max_box_h, tile_h)+1
    # consecutive H-tiles; clamp to the total number of tiles.
    grid_n = min(num_tiles, pl.cdiv(max(1, min(max_box_h, h)), tile_h) + 1)

    # Traced starting block, clamped so all visited blocks are in range and
    # the box is always fully covered.
    start_block = jnp.clip(low_h // tile_h, 0, num_tiles - grid_n)

    params = jnp.stack(
        [low_h, high_h, low_w, high_w, start_block]).astype(jnp.int32)

    kernel = functools.partial(_cutout_kernel, replace=int(replace) % 256)

    return pl.pallas_call(
        kernel,
        out_shape=jax.ShapeDtypeStruct((c, h, w), image.dtype),
        grid_spec=pltpu.PrefetchScalarGridSpec(
            num_scalar_prefetch=1,
            grid=(grid_n,),
            # Data-dependent index_map: only visit blocks start_block..+grid_n.
            in_specs=[pl.BlockSpec((c, tile_h, w),
                                   lambda i, prm: (0, prm[4] + i, 0))],
            out_specs=pl.BlockSpec((c, tile_h, w),
                                   lambda i, prm: (0, prm[4] + i, 0)),
        ),
        # Alias image -> output: untouched H-tiles keep the input bytes.
        # (params is input 0, image is input 1.)
        input_output_aliases={1: 0},
        compiler_params=pltpu.CompilerParams(
            dimension_semantics=("arbitrary",),
            vmem_limit_bytes=vmem_limit,
        ),
        cost_estimate=pl.CostEstimate(
            flops=0,
            transcendentals=0,
            bytes_accessed=2 * c * grid_n * tile_h * w * itemsize,
        ),
    )(params, image)


def cutout_pallas(image, key, *, p, pad_size, replace=128):
    """Apply Cutout to a uint8 (C, H, W) image using a Pallas TPU kernel."""
    c, h, w = image.shape
    pad_size = int(pad_size)
    k_apply, k_h, k_w = jax.random.split(key, 3)

    # torch.rand(1) < p
    apply_cut = jax.random.uniform(k_apply, ()) < p
    # torch.randint(high=h/w, size=(1,))
    center_h = jax.random.randint(k_h, (), 0, h, dtype=jnp.int32)
    center_w = jax.random.randint(k_w, (), 0, w, dtype=jnp.int32)

    low_h = jnp.clip(center_h - pad_size, 0, h)
    high_h = jnp.clip(center_h + pad_size, 0, h)
    low_w = jnp.clip(center_w - pad_size, 0, w)
    high_w = jnp.clip(center_w + pad_size, 0, w)

    # Fold the apply/skip decision into the box (empty box == no-op). This is
    # vmap/batch friendly (no lax.cond -> select divergence) and, thanks to the
    # box-restricted grid, the skip case only touches a couple of H-tiles.
    high_h = jnp.where(apply_cut, high_h, low_h)
    high_w = jnp.where(apply_cut, high_w, low_w)

    return _cutout_apply(image, low_h, high_h, low_w, high_w,
                         max_box_h=2 * pad_size, replace=replace)


def _reference(image, low_h, high_h, low_w, high_w, replace):
    _, h, w = image.shape
    row = jnp.arange(h)[:, None]
    col = jnp.arange(w)[None, :]
    box = (row >= low_h) & (row < high_h) & (col >= low_w) & (col < high_w)
    return jnp.where(box[None, :, :], jnp.uint8(replace), image)


if __name__ == "__main__":
    key = jax.random.PRNGKey(0)
    k_img, k_img2, k_aug = jax.random.split(key, 3)

    # Small deterministic uint8 "image": C=4, H=16, W=16 (channel-first).
    image = jax.random.randint(
        k_img, (4, 16, 16), minval=0, maxval=256, dtype=jnp.int32
    ).astype(jnp.uint8)

    # 1) Deterministic correctness check (single tile path).
    lh, hh, lw, hw = 3, 11, 5, 13
    ref1 = _reference(image, lh, hh, lw, hw, 128)
    out1 = _cutout_apply(
        image, jnp.int32(lh), jnp.int32(hh), jnp.int32(lw), jnp.int32(hw),
        max_box_h=8, replace=128)
    out1 = jax.block_until_ready(out1)
    assert bool(jnp.array_equal(out1, ref1))

    # 2) Deterministic multi-tile check exercising the box-restricted grid and
    #    input/output aliasing (untouched H-tiles must keep the input bytes).
    image2 = jax.random.randint(
        k_img2, (3, 128, 128), minval=0, maxval=256, dtype=jnp.int32
    ).astype(jnp.uint8)
    lh2, hh2, lw2, hw2 = 60, 76, 30, 46
    ref2 = _reference(image2, lh2, hh2, lw2, hw2, 200)
    out2 = _cutout_apply(
        image2, jnp.int32(lh2), jnp.int32(hh2), jnp.int32(lw2), jnp.int32(hw2),
        max_box_h=16, replace=200, tile_h=32)
    out2 = jax.block_until_ready(out2)
    assert bool(jnp.array_equal(out2, ref2))

    # 3) Random path, p=0: must be an exact identity (empty box).
    out_skip = jax.block_until_ready(
        cutout_pallas(image, k_aug, p=0.0, pad_size=4, replace=128))
    assert bool(jnp.array_equal(out_skip, image))

    # 4) Random path, p=1: must match a pure-JAX reference built from the same
    #    key-splitting scheme.
    k_apply, k_h, k_w = jax.random.split(k_aug, 3)
    ch_ = jax.random.randint(k_h, (), 0, 16, dtype=jnp.int32)
    cw_ = jax.random.randint(k_w, (), 0, 16, dtype=jnp.int32)
    ref4 = _reference(image,
                      jnp.clip(ch_ - 4, 0, 16), jnp.clip(ch_ + 4, 0, 16),
                      jnp.clip(cw_ - 4, 0, 16), jnp.clip(cw_ + 4, 0, 16), 128)
    out4 = jax.block_until_ready(
        cutout_pallas(image, k_aug, p=1.0, pad_size=4, replace=128))
    assert out4.shape == image.shape and out4.dtype == image.dtype
    assert bool(jnp.array_equal(out4, ref4))

    print("KERNEL_OK")
</pallas_src>

<mosaic_0001>
module attributes {stable_mosaic.version = 11 : i64} {
  func.func @_cutout_kernel(%arg0: i32, %arg1: memref<5xi32, #tpu.memory_space<smem>>, %arg2: memref<4x16x16xi8, #tpu.memory_space<vmem>>, %arg3: memref<4x16x16xi8, #tpu.memory_space<vmem>>) attributes {dimension_semantics = [#tpu.dimension_semantics<arbitrary>], iteration_bounds = array<i64: 1>, scalar_prefetch = 1 : i64, scratch_operands = 0 : i64, tpu.core_type = #tpu.core_type<tc>, window_params = [{transform_indices = @transform_0, window_bounds = array<i64: 4, 16, 16>}, {transform_indices = @transform_1, window_bounds = array<i64: 4, 16, 16>}]} {
    %c0 = arith.constant 0 : index
    %0 = memref.load %arg1[%c0] : memref<5xi32, #tpu.memory_space<smem>>
    %c1 = arith.constant 1 : index
    %1 = memref.load %arg1[%c1] : memref<5xi32, #tpu.memory_space<smem>>
    %c2 = arith.constant 2 : index
    %2 = memref.load %arg1[%c2] : memref<5xi32, #tpu.memory_space<smem>>
    %c3 = arith.constant 3 : index
    %3 = memref.load %arg1[%c3] : memref<5xi32, #tpu.memory_space<smem>>
    %c4 = arith.constant 4 : index
    %4 = memref.load %arg1[%c4] : memref<5xi32, #tpu.memory_space<smem>>
    %5 = arith.addi %4, %arg0 : i32
    %c16_i32 = arith.constant 16 : i32
    %6 = arith.muli %5, %c16_i32 : i32
    %7 = tpu.iota {dimensions = array<i32: 0>} : vector<16x1xi32>
    %8 = vector.broadcast %6 : i32 to vector<16x1xi32>
    %9 = arith.addi %8, %7 : vector<16x1xi32>
    %10 = tpu.iota {dimensions = array<i32: 1>} : vector<1x16xi32>
    %11 = vector.broadcast %0 : i32 to vector<16x1xi32>
    %12 = arith.cmpi sge, %9, %11 : vector<16x1xi32>
    %13 = vector.broadcast %1 : i32 to vector<16x1xi32>
    %14 = arith.cmpi slt, %9, %13 : vector<16x1xi32>
    %15 = arith.andi %12, %14 : vector<16x1xi1>
    %16 = vector.broadcast %2 : i32 to vector<1x16xi32>
    %17 = arith.cmpi sge, %10, %16 : vector<1x16xi32>
    %18 = vector.broadcast %15 : vector<16x1xi1> to vector<16x16xi1>
    %19 = vector.broadcast %17 : vector<1x16xi1> to vector<16x16xi1>
    %20 = arith.andi %18, %19 : vector<16x16xi1>
    %21 = vector.broadcast %3 : i32 to vector<1x16xi32>
    %22 = arith.cmpi slt, %10, %21 : vector<1x16xi32>
    %23 = vector.broadcast %22 : vector<1x16xi1> to vector<16x16xi1>
    %24 = arith.andi %20, %23 : vector<16x16xi1>
    %c0_0 = arith.constant 0 : index
    %c0_1 = arith.constant 0 : index
    %c0_2 = arith.constant 0 : index
    %25 = vector.load %arg2[%c0_0, %c0_1, %c0_2] : memref<4x16x16xi8, #tpu.memory_space<vmem>>, vector<1x16x16xi8>
    %26 = vector.shape_cast %25 : vector<1x16x16xi8> to vector<16x16xi8>
    %c-128_i8 = arith.constant -128 : i8
    %27 = vector.broadcast %c-128_i8 : i8 to vector<16x16xi8>
    %28 = arith.select %24, %27, %26 : vector<16x16xi1>, vector<16x16xi8>
    %c0_3 = arith.constant 0 : index
    %c0_4 = arith.constant 0 : index
    %c0_5 = arith.constant 0 : index
    %29 = vector.load %arg3[%c0_3, %c0_4, %c0_5] : memref<4x16x16xi8, #tpu.memory_space<vmem>>, vector<1x16x16xi8>
    %30 = vector.shape_cast %29 : vector<1x16x16xi8> to vector<16x16xi8>
    %31 = vector.shape_cast %28 : vector<16x16xi8> to vector<1x16x16xi8>
    tpu.vector_store %arg3[%c0_3, %c0_4, %c0_5], %31 {strides = array<i32>} : memref<4x16x16xi8, #tpu.memory_space<vmem>>, vector<1x16x16xi8>,
    %c1_6 = arith.constant 1 : index
    %c0_7 = arith.constant 0 : index
    %c0_8 = arith.constant 0 : index
    %32 = vector.load %arg2[%c1_6, %c0_7, %c0_8] : memref<4x16x16xi8, #tpu.memory_space<vmem>>, vector<1x16x16xi8>
    %33 = vector.shape_cast %32 : vector<1x16x16xi8> to vector<16x16xi8>
    %c-128_i8_9 = arith.constant -128 : i8
    %34 = vector.broadcast %c-128_i8_9 : i8 to vector<16x16xi8>
    %35 = arith.select %24, %34, %33 : vector<16x16xi1>, vector<16x16xi8>
    %c1_10 = arith.constant 1 : index
    %c0_11 = arith.constant 0 : index
    %c0_12 = arith.constant 0 : index
    %36 = vector.load %arg3[%c1_10, %c0_11, %c0_12] : memref<4x16x16xi8, #tpu.memory_space<vmem>>, vector<1x16x16xi8>
    %37 = vector.shape_cast %36 : vector<1x16x16xi8> to vector<16x16xi8>
    %38 = vector.shape_cast %35 : vector<16x16xi8> to vector<1x16x16xi8>
    tpu.vector_store %arg3[%c1_10, %c0_11, %c0_12], %38 {strides = array<i32>} : memref<4x16x16xi8, #tpu.memory_space<vmem>>, vector<1x16x16xi8>,
    %c2_13 = arith.constant 2 : index
    %c0_14 = arith.constant 0 : index
    %c0_15 = arith.constant 0 : index
    %39 = vector.load %arg2[%c2_13, %c0_14, %c0_15] : memref<4x16x16xi8, #tpu.memory_space<vmem>>, vector<1x16x16xi8>
    %40 = vector.shape_cast %39 : vector<1x16x16xi8> to vector<16x16xi8>
    %c-128_i8_16 = arith.constant -128 : i8
    %41 = vector.broadcast %c-128_i8_16 : i8 to vector<16x16xi8>
    %42 = arith.select %24, %41, %40 : vector<16x16xi1>, vector<16x16xi8>
    %c2_17 = arith.constant 2 : index
    %c0_18 = arith.constant 0 : index
    %c0_19 = arith.constant 0 : index
    %43 = vector.load %arg3[%c2_17, %c0_18, %c0_19] : memref<4x16x16xi8, #tpu.memory_space<vmem>>, vector<1x16x16xi8>
    %44 = vector.shape_cast %43 : vector<1x16x16xi8> to vector<16x16xi8>
    %45 = vector.shape_cast %42 : vector<16x16xi8> to vector<1x16x16xi8>
    tpu.vector_store %arg3[%c2_17, %c0_18, %c0_19], %45 {strides = array<i32>} : memref<4x16x16xi8, #tpu.memory_space<vmem>>, vector<1x16x16xi8>,
    %c3_20 = arith.constant 3 : index
    %c0_21 = arith.constant 0 : index
    %c0_22 = arith.constant 0 : index
    %46 = vector.load %arg2[%c3_20, %c0_21, %c0_22] : memref<4x16x16xi8, #tpu.memory_space<vmem>>, vector<1x16x16xi8>
    %47 = vector.shape_cast %46 : vector<1x16x16xi8> to vector<16x16xi8>
    %c-128_i8_23 = arith.constant -128 : i8
    %48 = vector.broadcast %c-128_i8_23 : i8 to vector<16x16xi8>
    %49 = arith.select %24, %48, %47 : vector<16x16xi1>, vector<16x16xi8>
    %c3_24 = arith.constant 3 : index
    %c0_25 = arith.constant 0 : index
    %c0_26 = arith.constant 0 : index
    %50 = vector.load %arg3[%c3_24, %c0_25, %c0_26] : memref<4x16x16xi8, #tpu.memory_space<vmem>>, vector<1x16x16xi8>
    %51 = vector.shape_cast %50 : vector<1x16x16xi8> to vector<16x16xi8>
    %52 = vector.shape_cast %49 : vector<16x16xi8> to vector<1x16x16xi8>
    tpu.vector_store %arg3[%c3_24, %c0_25, %c0_26], %52 {strides = array<i32>} : memref<4x16x16xi8, #tpu.memory_space<vmem>>, vector<1x16x16xi8>,
    return
  }
  func.func @transform_0(%arg0: i32, %arg1: memref<5xi32, #tpu.memory_space<smem>>) -> (i32, i32, i32) {
    %c4 = arith.constant 4 : index
    %0 = memref.load %arg1[%c4] : memref<5xi32, #tpu.memory_space<smem>>
    %1 = arith.addi %0, %arg0 : i32
    %c0_i32 = arith.constant 0 : i32
    %c0_i32_0 = arith.constant 0 : i32
    %c0_i32_1 = arith.constant 0 : i32
    return %c0_i32, %1, %c0_i32_0 : i32, i32, i32
  }
  func.func @transform_1(%arg0: i32, %arg1: memref<5xi32, #tpu.memory_space<smem>>) -> (i32, i32, i32) {
    %c4 = arith.constant 4 : index
    %0 = memref.load %arg1[%c4] : memref<5xi32, #tpu.memory_space<smem>>
    %1 = arith.addi %0, %arg0 : i32
    %c0_i32 = arith.constant 0 : i32
    %c0_i32_0 = arith.constant 0 : i32
    %c0_i32_1 = arith.constant 0 : i32
    return %c0_i32, %1, %c0_i32_0 : i32, i32, i32
  }
}

</mosaic_0001>

<bundles_post_ra>
// kernel: tpu_custom_call.1
= control target key start
LH: loop header
LB: loop body
LE: loop exit
PB: predicated region body
PF: predicated region fallthrough
CT: control target
= control target key end

     0   :  { %s239_s12 = smov [#allocation3]   ;;  %s339_s0 = inlined_call_operand.vmem [shape: s32[5], index: 0, kind: input, shape index: {}]   ;;  %s340_s1 = inlined_call_operand.hbm [shape: u8[4,16,16], index: 1, kind: input, shape index: {}, may-alias: {1,2}]   ;;  %s341_s2 = inlined_call_operand.hbm [shape: u8[4,16,16], index: 2, kind: output, shape index: {}, may-alias: {1,2}]  }
   0x1   :  { %s8_s11 = sshll.u32 %s339_s0, 4  ;;  %s9_s11 = int_to_ptr.vmem [resolvable:$true] %s8_s11 }
   0x2   :  { %11 = dma.vmem_to_smem %s9_s11, 16, %s239_s12, [#allocation2] }
   0x3   :  { %233 = dma.done.wait [#allocation2], 16 }
   0x4   :  { %234 = vsyncadd [#allocation2], 4294967280 }
   0x5   :  { %14 = sfence }
   0x6   :  { %15 = vsyncpa [#allocation5], 0 }
   0x7   :  { %16 = vsyncpa [#allocation6], 0  ;;  %s154_s13 = sld [smem:[#allocation3 + $0x4]]  ;;  %s240_s14 = smov [#allocation4]  }
   0x8   :  { %s28_s15 = sshll.u32 %s240_s14, 4  ;;  %s189_s24 = scalar_lea.hbm %s340_s1, 16  ;;  %s29_s15 = int_to_ptr.vmem [resolvable:$true] %s28_s15 }
   0xd   :  { %s165_s16 = sshll.u32 %s154_s13, 2 }
   0xe   :  { %s25_s19 = scalar_lea.hbm %s340_s1, %s165_s16 }
   0xf   :  { %s26_s20 = sshll.u32 %s25_s19, 4  ;;  %s27_s20 = int_to_ptr.hbm [resolvable:$true] %s26_s20 }
  0x10   :  { %s185_s0 = sshra.s32 %s27_s20, 4  ;;  %s186_s0 = int_to_ptr.hbm [resolvable:$true] %s185_s0 }
  0x11   :  { %s187_s21 = scalar_lea.hbm %s186_s0, 16  ;;  %p190_p1 = scmp.lt.s32.totalorder %s186_s0, %s340_s1 }
  0x12   :  { %p188_p0 = scmp.ne.s32.totalorder %s186_s0, %s187_s21  ;;  %p191_p2 = scmp.lt.s32.totalorder %s189_s24, %s187_s21 }
  0x14   :  { %p192_p3 = por %p191_p2, %p190_p1 }
  0x16   :  { %p193_p4 = pnand %p192_p3, %p188_p0 }
  0x18   :  { %196 = shalt.err (!%p193_p4)
}
  0x19   :  { %s241_s27 = smov 32   ;;  %s242_s28 = smov 2  }
  0x1a   :  { %34 = dma.hbm_to_vmem [thread:$0]  %s27_s20, 256, %s29_s15, [#allocation5], %s241_s27, %s241_s27, %s242_s28  }
  0x1b   :  { %235 = dma.done.wait [#allocation5], 256  }
  0x1c   :  { %236 = vsyncadd [#allocation5], 4294967040  ;;  %s46_s29 = sld [smem:[#allocation3]]  ;;  %v53_v0 = vlaneseq  ;;  %v243_v13 = vmov 0   ;;  %v85_v15 = vld [vmem:[#allocation4] sm:$0x3] }
  0x1d   :  { %s157_s30 = sld [smem:[#allocation3 + $0x1]]  ;;  %v103_v17 = vld [vmem:[#allocation4 + $0x4] sm:$0x3]  ;;  %vm99_vm12 = vcmask 123904   ;;  %v111_v18 = vld [vmem:[#allocation4 + $0x8] sm:$0x3] }
  0x1e   :  { %s158_s3 = sld [smem:[#allocation3 + $0x2]]  ;;  %v54_v1 = vshrl.u32 %v53_v0, 7  ;;  %v60_v3 = vand.u32 127, %v53_v0  ;;  %v86_v20 = vld [vmem:[#allocation4 + $0x2] sm:$0x3]  ;;  %s244_s10 = smov [#allocation7]  }
  0x1f   :  { %s159_s4 = sld [smem:[#allocation3 + $0x3]]  ;;  %v104_v21 = vld [vmem:[#allocation4 + $0x6] sm:$0x3]  ;;  %v112_v27 = vld [vmem:[#allocation4 + $0xa] sm:$0x3]  ;;  %s135_s11 = sshll.u32 %s244_s10, 4  ;;  %s136_s11 = int_to_ptr.vmem [resolvable:$true] %s135_s11 }
  0x20   :  { %s275_s5 = sld [smem:[#allocation3 + $0x4]]  ;;  %v55_v2 = vadd.s32 8, %v54_v1  ;;  %v119_v28 = vld [vmem:[#allocation4 + $0xc] sm:$0x3]  ;;  %v120_v30 = vld [vmem:[#allocation4 + $0xe] sm:$0x3] }
  0x21   :  { %s225_s17 = scalar_lea.hbm %s341_s2, 16 }
  0x22   :  { %v61_v6 = vstv %s46_s29 }
  0x23   :  { %v64_v7 = vstv %s157_s30 }
  0x24   :  { %v69_v4 = vstv %s158_s3 }
  0x25   :  { %v79_v8 = vstv %s159_s4  ;;  %vm278_vm0 = vcmp.ge.s32.totalorder %v60_v3, %v69_v4 }
  0x26   :  { %s161_s1 = sshll.u32 %s275_s5, 4  ;;  %vm282_vm3 = vcmp.lt.s32.totalorder %v60_v3, %v79_v8  ;;  %s166_s6 = sshll.u32 %s275_s5, 2 }
  0x27   :  { %v56_v5 = vstv %s161_s1  ;;  %s134_s9 = scalar_lea.hbm %s341_s2, %s166_s6 }
  0x28   :  { %v57_v9 = vadd.s32 %v56_v5, %v54_v1  ;;  %v58_v10 = vadd.s32 %v56_v5, %v55_v2  ;;  %s137_s12 = sshll.u32 %s134_s9, 4  ;;  %s138_s12 = int_to_ptr.hbm [resolvable:$true] %s137_s12 }
  0x29   :  { %s221_s13 = sshra.s32 %s138_s12, 4  ;;  %s222_s13 = int_to_ptr.hbm [resolvable:$true] %s221_s13 }
  0x2a   :  { %vm62_vm1 = vcmp.ge.s32.totalorder %v57_v9, %v61_v6  ;;  %vm65_vm2 = vcmp.lt.s32.totalorder %v57_v9, %v64_v7  ;;  %vm63_vm6 = vcmp.ge.s32.totalorder %v58_v10, %v61_v6  ;;  %vm66_vm7 = vcmp.lt.s32.totalorder %v58_v10, %v64_v7  ;;  %s223_s14 = scalar_lea.hbm %s222_s13, 16  ;;  %p226_p6 = scmp.lt.s32.totalorder %s222_s13, %s341_s2 }
  0x2b   :  { %vm67_vm4 = vmand %vm62_vm1, %vm65_vm2  ;;  %p224_p5 = scmp.ne.s32.totalorder %s222_s13, %s223_s14  ;;  %p227_p7 = scmp.lt.s32.totalorder %s225_s17, %s223_s14 }
  0x2c   :  { %vm77_vm5 = vmand %vm67_vm4, %vm278_vm0 }
  0x2d   :  { %vm83_vm8 = vmand %vm77_vm5, %vm282_vm3  ;;  %p228_p8 = por %p227_p7, %p226_p6 }
  0x2e   :  { %vm87_vm9 = vmpackc.low %vm83_vm8, %vm83_vm8 }
  0x2f   :  { %v88_v14 = vsel %vm87_vm9, 16711935, %v243_v13  ;;  %vm68_vm10 = vmand %vm63_vm6, %vm66_vm7  ;;  %p229_p9 = pnand %p228_p8, %p224_p5 }
  0x30   :  { %v90_v16 = vpack.c.b8 %v88_v14, %v88_v14  ;;  %vm78_vm11 = vmand %vm68_vm10, %vm278_vm0 }
  0x31   :  { %vm84_vm13 = vmand %vm78_vm11, %vm282_vm3 }
  0x32   :  { %vm295_vm14 = vnez %v90_v16  ;;  %vm92_vm15 = vmpackc.low %vm84_vm13, %vm84_vm13 }
  0x33   :  { %v97_v22 = vsel %vm295_vm14, 2155905152, %v85_v15  ;;  %v93_v23 = vsel %vm92_vm15, 16711935, %v243_v13  ;;  %v105_v24 = vsel %vm295_vm14, 2155905152, %v103_v17 }
  0x34   :  { %100 = vst.msk [vmem:[#allocation7] sm:$0x3] %vm99_vm12, %v97_v22  ;;  %v95_v25 = vpack.c.b8 %v93_v23, %v93_v23  ;;  %v113_v26 = vsel %vm295_vm14, 2155905152, %v111_v18  ;;  %v121_v34 = vsel %vm295_vm14, 2155905152, %v119_v28 }
  0x35   :  { %108 = vst.msk [vmem:[#allocation7 + $0x4] sm:$0x3] %vm99_vm12, %v105_v24 }
  0x36   :  { %vm310_vm0 = vnez %v95_v25  ;;  %116 = vst.msk [vmem:[#allocation7 + $0x8] sm:$0x3] %vm99_vm12, %v113_v26 }
  0x37   :  { %v98_v31 = vsel %vm310_vm0, 2155905152, %v86_v20  ;;  %v106_v32 = vsel %vm310_vm0, 2155905152, %v104_v21  ;;  %v114_v33 = vsel %vm310_vm0, 2155905152, %v112_v27 }
  0x38   :  { %101 = vst.msk [vmem:[#allocation7 + $0x2] sm:$0x3] %vm99_vm12, %v98_v31  ;;  %v122_v35 = vsel %vm310_vm0, 2155905152, %v120_v30 }
  0x39   :  { %109 = vst.msk [vmem:[#allocation7 + $0x6] sm:$0x3] %vm99_vm12, %v106_v32 }
  0x3a   :  { %117 = vst.msk [vmem:[#allocation7 + $0xa] sm:$0x3] %vm99_vm12, %v114_v33 }
  0x3b   :  { %124 = vst.msk [vmem:[#allocation7 + $0xc] sm:$0x3] %vm99_vm12, %v121_v34 }
  0x3c   :  { %125 = vst.msk [vmem:[#allocation7 + $0xe] sm:$0x3] %vm99_vm12, %v122_v35 }
  0x3d   :  { %232 = shalt.err (!%p229_p9)
}
  0x3e   :  { %143 = dma.vmem_to_hbm [thread:$0]  %s136_s11, 256, %s138_s12, [#allocation6], %s241_s27, %s241_s27, %s242_s28  }
  0x3f   :  { %237 = dma.done.wait [#allocation6], 256  }
  0x40   :  { %238 = vsyncadd [#allocation6], 4294967040 }
  0x41   :  { %148 = vsyncpa [#allocation5], 1 }
  0x42   :  { %149 = vsyncpa [#allocation6], 1 }

</bundles_post_ra>
